<compile_context>
chip_gen: v6e
topology: v6e:2x2x1
jax: 0.10.0
libtpu: 0.0.40
codegen_flags: <defaults>
</compile_context>

<pallas_src>
import jax
import jax.numpy as jnp
from jax.experimental import pallas as pl
from jax.experimental.pallas import tpu as pltpu

LN_EPS = 1e-5  # torch.nn.LayerNorm default

_VMEM_LIMIT_BYTES = 32 * 1024 * 1024   # explicit scoped-VMEM limit (ok on v5e/v6e/v7x)
_VMEM_TILE_BUDGET = 24 * 1024 * 1024   # what we size TILE_B against (headroom left)


def _critic_kernel(x_ref,
                   w1_ref, b1_ref, g_ref, beta_ref,
                   w2_ref, b2_ref,
                   w3_ref, b3_ref,
                   w4_ref, b4_ref,
                   o_ref):
    x = x_ref[...].astype(jnp.float32)

    # Linear 1 (MXU) + bias.
    h = jnp.dot(x, w1_ref[...], preferred_element_type=jnp.float32) + b1_ref[...]

    # LayerNorm over last dim: biased variance, eps inside rsqrt (torch default),
    # affine applied as a single scale/shift on the normalized value.
    mu = jnp.mean(h, axis=-1, keepdims=True)
    hc = h - mu
    var = jnp.mean(hc * hc, axis=-1, keepdims=True)
    h = hc * jax.lax.rsqrt(var + LN_EPS) * g_ref[...] + beta_ref[...]
    h = jnp.maximum(h, 0.0)

    # Linear 2 + ReLU (MXU).
    h = jnp.maximum(
        jnp.dot(h, w2_ref[...], preferred_element_type=jnp.float32) + b2_ref[...], 0.0)

    # Linear 3 + ReLU (MXU).
    h = jnp.maximum(
        jnp.dot(h, w3_ref[...], preferred_element_type=jnp.float32) + b3_ref[...], 0.0)

    # Final value head (out_features = 1): VPU multiply + lane reduction instead
    # of driving the MXU with a 1-lane-wide RHS. w4 is a [1, hidden] row.
    out = jnp.sum(h * w4_ref[...], axis=-1, keepdims=True) + b4_ref[...]
    o_ref[...] = out.astype(o_ref.dtype)


def _round_up(x, m):
    return ((x + m - 1) // m) * m


def _pick_tile_b(batch, input_dim, hidden_dim):
    """Largest batch tile (multiple of 8, <= 2048) that fits the VMEM budget."""
    # Rough f32 bytes per batch row held live per grid step:
    #   double-buffered x block + output block + a few hidden-width temporaries.
    bytes_per_row = 4 * (2 * input_dim + 4 * hidden_dim + 2 + 8)
    tile = _VMEM_TILE_BUDGET // max(1, bytes_per_row)
    tile = max(8, min(2048, tile))
    tile = (tile // 8) * 8
    tile = min(tile, _round_up(batch, 8))  # never tile past the (padded) batch
    return tile


def critic_mlp_forward(x, params, tile_b=None):
    """x: [B, input_dim] float32. params: dict of weights. Returns [B, 1] float32."""
    B, input_dim = x.shape
    hidden_dim = params["w1"].shape[1]

    if tile_b is None:
        tile_b = _pick_tile_b(B, input_dim, hidden_dim)
    b_pad = _round_up(B, tile_b)
    if b_pad != B:
        # Padded rows produce garbage values that are sliced off below; LN on a
        # padded (zero) row is still finite since var + eps > 0.
        x = jnp.pad(x, ((0, b_pad - B), (0, 0)))
    n_tiles = b_pad // tile_b

    weight_args = (
        params["w1"], params["b1"], params["ln_g"], params["ln_b"],
        params["w2"], params["b2"],
        params["w3"], params["b3"],
        params["w4_row"], params["b4"],
    )

    const_map = lambda i: (0, 0)  # weights stay VMEM-resident across the grid
    in_specs = [pl.BlockSpec((tile_b, input_dim), lambda i: (i, 0))]
    in_specs += [pl.BlockSpec(w.shape, const_map) for w in weight_args]

    flops = 2 * B * (input_dim * hidden_dim + 2 * hidden_dim * hidden_dim + hidden_dim)
    bytes_accessed = 4 * (B * input_dim + B + sum(int(w.size) for w in weight_args))
    cost = pl.CostEstimate(flops=flops, transcendentals=B, bytes_accessed=bytes_accessed)

    out = pl.pallas_call(
        _critic_kernel,
        out_shape=jax.ShapeDtypeStruct((b_pad, 1), jnp.float32),
        grid=(n_tiles,),
        in_specs=in_specs,
        # TODO(synk): output last-dim of 1 forces masked stores; a lane-dense
        # [n_tiles, tile_b] output layout would need an in-kernel transpose.
        out_specs=pl.BlockSpec((tile_b, 1), lambda i: (i, 0)),
        compiler_params=pltpu.CompilerParams(
            dimension_semantics=("parallel",),      # megacore split on v7x
            vmem_limit_bytes=_VMEM_LIMIT_BYTES,
        ),
        cost_estimate=cost,
    )(x, *weight_args)
    return out[:B]


def init_params(key, input_dim, hidden_dim):
    """Deterministic init mimicking PyTorch Linear defaults (uniform +-1/sqrt(fan_in))."""
    ks = jax.random.split(key, 8)

    def lin(kw, kb, fan_in, fan_out):
        bound = 1.0 / jnp.sqrt(fan_in)
        w = jax.random.uniform(kw, (fan_in, fan_out), jnp.float32, -bound, bound)
        b = jax.random.uniform(kb, (1, fan_out), jnp.float32, -bound, bound)
        return w, b

    w1, b1 = lin(ks[0], ks[1], input_dim, hidden_dim)
    w2, b2 = lin(ks[2], ks[3], hidden_dim, hidden_dim)
    w3, b3 = lin(ks[4], ks[5], hidden_dim, hidden_dim)
    # Value head stored as a [1, hidden] row (VPU path in the kernel).
    bound4 = 1.0 / jnp.sqrt(hidden_dim)
    w4_row = jax.random.uniform(ks[6], (1, hidden_dim), jnp.float32, -bound4, bound4)
    b4 = jax.random.uniform(ks[7], (1, 1), jnp.float32, -bound4, bound4)
    return {
        "w1": w1, "b1": b1,
        "ln_g": jnp.ones((1, hidden_dim), jnp.float32),   # LayerNorm weight init = 1
        "ln_b": jnp.zeros((1, hidden_dim), jnp.float32),  # LayerNorm bias init = 0
        "w2": w2, "b2": b2,
        "w3": w3, "b3": b3,
        "w4_row": w4_row, "b4": b4,
    }


def critic_mlp_ref(x, p):
    """Pure-JAX reference (matches PyTorch semantics)."""
    h = x @ p["w1"] + p["b1"]
    mu = h.mean(-1, keepdims=True)
    var = ((h - mu) ** 2).mean(-1, keepdims=True)
    h = (h - mu) / jnp.sqrt(var + LN_EPS) * p["ln_g"] + p["ln_b"]
    h = jnp.maximum(h, 0.0)
    h = jnp.maximum(h @ p["w2"] + p["b2"], 0.0)
    h = jnp.maximum(h @ p["w3"] + p["b3"], 0.0)
    return jnp.sum(h * p["w4_row"], axis=-1, keepdims=True) + p["b4"]


if __name__ == "__main__":
    key = jax.random.PRNGKey(0)
    k_param, k_obs1, k_obs2 = jax.random.split(key, 3)

    batch, input_dim, hidden_dim = 8, 16, 32
    params = init_params(k_param, input_dim, hidden_dim)

    # Case 1: batch already a multiple of the (auto-picked) tile.
    observations = {"obs": jax.random.normal(k_obs1, (batch, input_dim), jnp.float32)}
    out = critic_mlp_forward(observations["obs"], params)
    out = jax.block_until_ready(out)
    ref = critic_mlp_ref(observations["obs"], params)
    assert out.shape == (batch, 1), out.shape
    assert jnp.allclose(out, ref, atol=1e-4, rtol=1e-4), (out, ref)

    # Case 2: ragged batch exercising the pad/slice + multi-tile grid path.
    x2 = jax.random.normal(k_obs2, (37, input_dim), jnp.float32)
    out2 = jax.block_until_ready(critic_mlp_forward(x2, params, tile_b=8))
    ref2 = critic_mlp_ref(x2, params)
    assert out2.shape == (37, 1), out2.shape
    assert jnp.allclose(out2, ref2, atol=1e-4, rtol=1e-4), (out2, ref2)

    print("KERNEL_OK")
</pallas_src>

<mosaic_0001>
module attributes {stable_mosaic.version = 11 : i64} {
  func.func @_critic_kernel(%arg0: i32, %arg1: memref<8x16xf32, #tpu.memory_space<vmem>>, %arg2: memref<16x32xf32, #tpu.memory_space<vmem>>, %arg3: memref<1x32xf32, #tpu.memory_space<vmem>>, %arg4: memref<1x32xf32, #tpu.memory_space<vmem>>, %arg5: memref<1x32xf32, #tpu.memory_space<vmem>>, %arg6: memref<32x32xf32, #tpu.memory_space<vmem>>, %arg7: memref<1x32xf32, #tpu.memory_space<vmem>>, %arg8: memref<32x32xf32, #tpu.memory_space<vmem>>, %arg9: memref<1x32xf32, #tpu.memory_space<vmem>>, %arg10: memref<1x32xf32, #tpu.memory_space<vmem>>, %arg11: memref<1x1xf32, #tpu.memory_space<vmem>>, %arg12: memref<8x1xf32, #tpu.memory_space<vmem>>) attributes {dimension_semantics = [#tpu.dimension_semantics<parallel>], iteration_bounds = array<i64: 1>, scalar_prefetch = 0 : i64, scratch_operands = 0 : i64, tpu.core_type = #tpu.core_type<tc>, window_params = [{transform_indices = @transform_0, window_bounds = array<i64: 8, 16>}, {pipeline_mode = #tpu.pipeline_mode<synchronous>, transform_indices = @transform_1, window_bounds = array<i64: 16, 32>}, {pipeline_mode = #tpu.pipeline_mode<synchronous>, transform_indices = @transform_2, window_bounds = array<i64: 1, 32>}, {pipeline_mode = #tpu.pipeline_mode<synchronous>, transform_indices = @transform_3, window_bounds = array<i64: 1, 32>}, {pipeline_mode = #tpu.pipeline_mode<synchronous>, transform_indices = @transform_4, window_bounds = array<i64: 1, 32>}, {pipeline_mode = #tpu.pipeline_mode<synchronous>, transform_indices = @transform_5, window_bounds = array<i64: 32, 32>}, {pipeline_mode = #tpu.pipeline_mode<synchronous>, transform_indices = @transform_6, window_bounds = array<i64: 1, 32>}, {pipeline_mode = #tpu.pipeline_mode<synchronous>, transform_indices = @transform_7, window_bounds = array<i64: 32, 32>}, {pipeline_mode = #tpu.pipeline_mode<synchronous>, transform_indices = @transform_8, window_bounds = array<i64: 1, 32>}, {pipeline_mode = #tpu.pipeline_mode<synchronous>, transform_indices = @transform_9, window_bounds = array<i64: 1, 32>}, {pipeline_mode = #tpu.pipeline_mode<synchronous>, transform_indices = @transform_10, window_bounds = array<i64: 1, 1>}, {transform_indices = @transform_11, window_bounds = array<i64: 8, 1>}]} {
    %c0 = arith.constant 0 : index
    %c0_0 = arith.constant 0 : index
    %0 = vector.load %arg1[%c0, %c0_0] : memref<8x16xf32, #tpu.memory_space<vmem>>, vector<8x16xf32>
    %c0_1 = arith.constant 0 : index
    %c0_2 = arith.constant 0 : index
    %1 = vector.load %arg2[%c0_1, %c0_2] : memref<16x32xf32, #tpu.memory_space<vmem>>, vector<16x32xf32>
    %cst = arith.constant dense<0.000000e+00> : vector<8x32xf32>
    %2 = tpu.matmul %0, %1, %cst {dimension_numbers = #tpu.dot_dimension_numbers<[1], [0], [0], [1], [0, 0, 1, 1], [], []>} : vector<8x16xf32>, vector<16x32xf32>, vector<8x32xf32> -> vector<8x32xf32>
    %c0_3 = arith.constant 0 : index
    %c0_4 = arith.constant 0 : index
    %3 = vector.load %arg3[%c0_3, %c0_4] : memref<1x32xf32, #tpu.memory_space<vmem>>, vector<1x32xf32>
    %4 = vector.broadcast %3 : vector<1x32xf32> to vector<8x32xf32>
    %5 = arith.addf %2, %4 : vector<8x32xf32>
    %cst_5 = arith.constant dense<0.000000e+00> : vector<8xf32>
    %6 = vector.multi_reduction <add>, %5, %cst_5 [1] : vector<8x32xf32> to vector<8xf32>
    %7 = vector.shape_cast %6 : vector<8xf32> to vector<8x1xf32>
    %cst_6 = arith.constant 3.200000e+01 : f32
    %8 = vector.broadcast %cst_6 : f32 to vector<8x1xf32>
    %9 = arith.divf %7, %8 : vector<8x1xf32>
    %10 = vector.broadcast %9 : vector<8x1xf32> to vector<8x32xf32>
    %11 = arith.subf %5, %10 : vector<8x32xf32>
    %12 = arith.mulf %11, %11 : vector<8x32xf32>
    %cst_7 = arith.constant dense<0.000000e+00> : vector<8xf32>
    %13 = vector.multi_reduction <add>, %12, %cst_7 [1] : vector<8x32xf32> to vector<8xf32>
    %14 = vector.shape_cast %13 : vector<8xf32> to vector<8x1xf32>
    %cst_8 = arith.constant 3.200000e+01 : f32
    %15 = vector.broadcast %cst_8 : f32 to vector<8x1xf32>
    %16 = arith.divf %14, %15 : vector<8x1xf32>
    %cst_9 = arith.constant 9.99999974E-6 : f32
    %17 = vector.broadcast %cst_9 : f32 to vector<8x1xf32>
    %18 = arith.addf %16, %17 : vector<8x1xf32>
    %19 = math.rsqrt %18 : vector<8x1xf32>
    %20 = vector.broadcast %19 : vector<8x1xf32> to vector<8x32xf32>
    %21 = arith.mulf %11, %20 : vector<8x32xf32>
    %c0_10 = arith.constant 0 : index
    %c0_11 = arith.constant 0 : index
    %22 = vector.load %arg4[%c0_10, %c0_11] : memref<1x32xf32, #tpu.memory_space<vmem>>, vector<1x32xf32>
    %23 = vector.broadcast %22 : vector<1x32xf32> to vector<8x32xf32>
    %24 = arith.mulf %21, %23 : vector<8x32xf32>
    %c0_12 = arith.constant 0 : index
    %c0_13 = arith.constant 0 : index
    %25 = vector.load %arg5[%c0_12, %c0_13] : memref<1x32xf32, #tpu.memory_space<vmem>>, vector<1x32xf32>
    %26 = vector.broadcast %25 : vector<1x32xf32> to vector<8x32xf32>
    %27 = arith.addf %24, %26 : vector<8x32xf32>
    %cst_14 = arith.constant 0.000000e+00 : f32
    %28 = vector.broadcast %cst_14 : f32 to vector<8x32xf32>
    %29 = arith.maximumf %27, %28 : vector<8x32xf32>
    %c0_15 = arith.constant 0 : index
    %c0_16 = arith.constant 0 : index
    %30 = vector.load %arg6[%c0_15, %c0_16] : memref<32x32xf32, #tpu.memory_space<vmem>>, vector<32x32xf32>
    %cst_17 = arith.constant dense<0.000000e+00> : vector<8x32xf32>
    %31 = tpu.matmul %29, %30, %cst_17 {dimension_numbers = #tpu.dot_dimension_numbers<[1], [0], [0], [1], [0, 0, 1, 1], [], []>} : vector<8x32xf32>, vector<32x32xf32>, vector<8x32xf32> -> vector<8x32xf32>
    %c0_18 = arith.constant 0 : index
    %c0_19 = arith.constant 0 : index
    %32 = vector.load %arg7[%c0_18, %c0_19] : memref<1x32xf32, #tpu.memory_space<vmem>>, vector<1x32xf32>
    %33 = vector.broadcast %32 : vector<1x32xf32> to vector<8x32xf32>
    %34 = arith.addf %31, %33 : vector<8x32xf32>
    %cst_20 = arith.constant 0.000000e+00 : f32
    %35 = vector.broadcast %cst_20 : f32 to vector<8x32xf32>
    %36 = arith.maximumf %34, %35 : vector<8x32xf32>
    %c0_21 = arith.constant 0 : index
    %c0_22 = arith.constant 0 : index
    %37 = vector.load %arg8[%c0_21, %c0_22] : memref<32x32xf32, #tpu.memory_space<vmem>>, vector<32x32xf32>
    %cst_23 = arith.constant dense<0.000000e+00> : vector<8x32xf32>
    %38 = tpu.matmul %36, %37, %cst_23 {dimension_numbers = #tpu.dot_dimension_numbers<[1], [0], [0], [1], [0, 0, 1, 1], [], []>} : vector<8x32xf32>, vector<32x32xf32>, vector<8x32xf32> -> vector<8x32xf32>
    %c0_24 = arith.constant 0 : index
    %c0_25 = arith.constant 0 : index
    %39 = vector.load %arg9[%c0_24, %c0_25] : memref<1x32xf32, #tpu.memory_space<vmem>>, vector<1x32xf32>
    %40 = vector.broadcast %39 : vector<1x32xf32> to vector<8x32xf32>
    %41 = arith.addf %38, %40 : vector<8x32xf32>
    %cst_26 = arith.constant 0.000000e+00 : f32
    %42 = vector.broadcast %cst_26 : f32 to vector<8x32xf32>
    %43 = arith.maximumf %41, %42 : vector<8x32xf32>
    %c0_27 = arith.constant 0 : index
    %c0_28 = arith.constant 0 : index
    %44 = vector.load %arg10[%c0_27, %c0_28] : memref<1x32xf32, #tpu.memory_space<vmem>>, vector<1x32xf32>
    %45 = vector.broadcast %44 : vector<1x32xf32> to vector<8x32xf32>
    %46 = arith.mulf %43, %45 : vector<8x32xf32>
    %cst_29 = arith.constant dense<0.000000e+00> : vector<8xf32>
    %47 = vector.multi_reduction <add>, %46, %cst_29 [1] : vector<8x32xf32> to vector<8xf32>
    %48 = vector.shape_cast %47 : vector<8xf32> to vector<8x1xf32>
    %c0_30 = arith.constant 0 : index
    %c0_31 = arith.constant 0 : index
    %49 = vector.load %arg11[%c0_30, %c0_31] : memref<1x1xf32, #tpu.memory_space<vmem>>, vector<1x1xf32>
    %50 = vector.broadcast %49 : vector<1x1xf32> to vector<8x1xf32>
    %51 = arith.addf %48, %50 : vector<8x1xf32>
    %c0_32 = arith.constant 0 : index
    %c0_33 = arith.constant 0 : index
    %52 = vector.load %arg12[%c0_32, %c0_33] : memref<8x1xf32, #tpu.memory_space<vmem>>, vector<8x1xf32>
    tpu.vector_store %arg12[%c0_32, %c0_33], %51 {strides = array<i32>} : memref<8x1xf32, #tpu.memory_space<vmem>>, vector<8x1xf32>,
    return
  }
  func.func @transform_0(%arg0: i32) -> (i32, i32) {
    %c0_i32 = arith.constant 0 : i32
    %c0_i32_0 = arith.constant 0 : i32
    return %arg0, %c0_i32 : i32, i32
  }
  func.func @transform_1(%arg0: i32) -> (i32, i32) {
    %c0_i32 = arith.constant 0 : i32
    %c0_i32_0 = arith.constant 0 : i32
    %c0_i32_1 = arith.constant 0 : i32
    return %c0_i32, %c0_i32_0 : i32, i32
  }
  func.func @transform_2(%arg0: i32) -> (i32, i32) {
    %c0_i32 = arith.constant 0 : i32
    %c0_i32_0 = arith.constant 0 : i32
    %c0_i32_1 = arith.constant 0 : i32
    return %c0_i32, %c0_i32_0 : i32, i32
  }
  func.func @transform_3(%arg0: i32) -> (i32, i32) {
    %c0_i32 = arith.constant 0 : i32
    %c0_i32_0 = arith.constant 0 : i32
    %c0_i32_1 = arith.constant 0 : i32
    return %c0_i32, %c0_i32_0 : i32, i32
  }
  func.func @transform_4(%arg0: i32) -> (i32, i32) {
    %c0_i32 = arith.constant 0 : i32
    %c0_i32_0 = arith.constant 0 : i32
    %c0_i32_1 = arith.constant 0 : i32
    return %c0_i32, %c0_i32_0 : i32, i32
  }
  func.func @transform_5(%arg0: i32) -> (i32, i32) {
    %c0_i32 = arith.constant 0 : i32
    %c0_i32_0 = arith.constant 0 : i32
    %c0_i32_1 = arith.constant 0 : i32
    return %c0_i32, %c0_i32_0 : i32, i32
  }
  func.func @transform_6(%arg0: i32) -> (i32, i32) {
    %c0_i32 = arith.constant 0 : i32
    %c0_i32_0 = arith.constant 0 : i32
    %c0_i32_1 = arith.constant 0 : i32
    return %c0_i32, %c0_i32_0 : i32, i32
  }
  func.func @transform_7(%arg0: i32) -> (i32, i32) {
    %c0_i32 = arith.constant 0 : i32
    %c0_i32_0 = arith.constant 0 : i32
    %c0_i32_1 = arith.constant 0 : i32
    return %c0_i32, %c0_i32_0 : i32, i32
  }
  func.func @transform_8(%arg0: i32) -> (i32, i32) {
    %c0_i32 = arith.constant 0 : i32
    %c0_i32_0 = arith.constant 0 : i32
    %c0_i32_1 = arith.constant 0 : i32
    return %c0_i32, %c0_i32_0 : i32, i32
  }
  func.func @transform_9(%arg0: i32) -> (i32, i32) {
    %c0_i32 = arith.constant 0 : i32
    %c0_i32_0 = arith.constant 0 : i32
    %c0_i32_1 = arith.constant 0 : i32
    return %c0_i32, %c0_i32_0 : i32, i32
  }
  func.func @transform_10(%arg0: i32) -> (i32, i32) {
    %c0_i32 = arith.constant 0 : i32
    %c0_i32_0 = arith.constant 0 : i32
    %c0_i32_1 = arith.constant 0 : i32
    return %c0_i32, %c0_i32_0 : i32, i32
  }
  func.func @transform_11(%arg0: i32) -> (i32, i32) {
    %c0_i32 = arith.constant 0 : i32
    %c0_i32_0 = arith.constant 0 : i32
    return %arg0, %c0_i32 : i32, i32
  }
}

</mosaic_0001>

<bundles_post_ra>
// kernel: tpu_custom_call.1
= control target key start
LH: loop header
LB: loop body
LE: loop exit
PB: predicated region body
PF: predicated region fallthrough
CT: control target
= control target key end

     0   :  { %s673_s0 = inlined_call_operand.hbm [shape: f32[8,16], index: 0, kind: input, shape index: {}]   ;;  %s674_s1 = inlined_call_operand.hbm [shape: f32[16,32], index: 1, kind: input, shape index: {}]   ;;  %s675_s2 = inlined_call_operand.vmem [shape: f32[1,32], index: 2, kind: input, shape index: {}]   ;;  %s676_s3 = inlined_call_operand.vmem [shape: f32[1,32], index: 3, kind: input, shape index: {}]   ;;  %s677_s4 = inlined_call_operand.vmem [shape: f32[1,32], index: 4, kind: input, shape index: {}]   ;;  %s678_s5 = inlined_call_operand.hbm [shape: f32[32,32], index: 5, kind: input, shape index: {}]   ;;  %s679_s6 = inlined_call_operand.vmem [shape: f32[1,32], index: 6, kind: input, shape index: {}]   ;;  %s680_s7 = inlined_call_operand.hbm [shape: f32[32,32], index: 7, kind: input, shape index: {}]   ;;  %s681_s8 = inlined_call_operand.vmem [shape: f32[1,32], index: 8, kind: input, shape index: {}]   ;;  %s682_s9 = inlined_call_operand.vmem [shape: f32[1,32], index: 9, kind: input, shape index: {}]   ;;  %s683_s10 = inlined_call_operand.<no memory space> [shape: f32[1,1], index: 10, kind: input, shape index: {}]   ;;  %s684_s11 = inlined_call_operand.vmem [shape: f32[8,1], index: 11, kind: output, shape index: {}]  }
   0x1   :  { %v16_v0 = vstv %s683_s10 }
   0x2   :  { %17 = vst [vmem:[#allocation2] sm:$0x1] %v16_v0 }
   0x3   :  { %18 = vsyncpa [#allocation4], 0 }
   0x4   :  { %19 = vsyncpa [#allocation6], 0 }
   0x5   :  { %20 = vsyncpa [#allocation9], 0  ;;  %s555_s19 = smov [#allocation5]  }
   0x6   :  { %s36_s20 = sshll.u32 %s555_s19, 4  ;;  %s37_s20 = int_to_ptr.vmem [resolvable:$true] %s36_s20 }
   0x7   :  { %s477_s21 = scalar_lea.vmem %s37_s20, 256  ;;  %p482_p1 = scmp.lt.s32.totalorder %s37_s20, %s37_s20 }
   0x8   :  { %p478_p0 = scmp.ne.s32.totalorder %s37_s20, %s477_s21  ;;  %p483_p2 = scmp.lt.s32.totalorder %s477_s21, %s477_s21 }
   0xa   :  { %p484_p3 = por %p483_p2, %p482_p1 }
   0xc   :  { %p485_p4 = pnand %p484_p3, %p478_p0 }
   0xe   :  { %488 = shalt.err (!%p485_p4)
}
   0xf   :  { %s556_s22 = smov 128   ;;  %s557_s23 = smov 8  }
  0x10   :  { %42 = dma.hbm_to_vmem [thread:$0]  %s674_s1, 256, %s37_s20, [#allocation6], %s556_s22, %s556_s22, %s557_s23  }
  0x11   :  { %s558_s25 = smov [#allocation3]   ;;  %s559_s27 = smov [#allocation7]  }
  0x12   :  { %s27_s26 = sshll.u32 %s558_s25, 4  ;;  %s54_s28 = sshll.u32 %s559_s27, 4  ;;  %s28_s26 = int_to_ptr.vmem [resolvable:$true] %s27_s26  ;;  %s55_s28 = int_to_ptr.vmem [resolvable:$true] %s54_s28 }
  0x13   :  { %s497_s29 = scalar_lea.vmem %s28_s26, 128  ;;  %p502_p6 = scmp.lt.s32.totalorder %s28_s26, %s28_s26 }
  0x14   :  { %p498_p5 = scmp.ne.s32.totalorder %s28_s26, %s497_s29  ;;  %p503_p7 = scmp.lt.s32.totalorder %s497_s29, %s497_s29 }
  0x16   :  { %p504_p8 = por %p503_p7, %p502_p6 }
  0x18   :  { %p505_p9 = pnand %p504_p8, %p498_p5 }
  0x1a   :  { %508 = shalt.err (!%p505_p9)
}
  0x1b   :  { %30 = dma.hbm_to_vmem [thread:$0]  %s673_s0, 128, %s28_s26, [#allocation4]  }
  0x1c   :  { %s517_s13 = scalar_lea.vmem %s55_s28, 512  ;;  %p522_p11 = scmp.lt.s32.totalorder %s55_s28, %s55_s28 }
  0x1d   :  { %p518_p10 = scmp.ne.s32.totalorder %s55_s28, %s517_s13  ;;  %p523_p12 = scmp.lt.s32.totalorder %s517_s13, %s517_s13 }
  0x1f   :  { %p524_p13 = por %p523_p12, %p522_p11 }
  0x21   :  { %p525_p0 = pnand %p524_p13, %p518_p10 }
  0x23   :  { %528 = shalt.err (!%p525_p0)
}
  0x24   :  { %60 = dma.hbm_to_vmem [thread:$0]  %s678_s5, 512, %s55_s28, [#allocation6], %s556_s22, %s556_s22, %s557_s23  }
  0x25   :  { %s560_s15 = smov [#allocation8]  }
  0x26   :  { %s68_s16 = sshll.u32 %s560_s15, 4  ;;  %s69_s16 = int_to_ptr.vmem [resolvable:$true] %s68_s16 }
  0x27   :  { %s537_s17 = scalar_lea.vmem %s69_s16, 512  ;;  %p542_p2 = scmp.lt.s32.totalorder %s69_s16, %s69_s16 }
  0x28   :  { %p538_p1 = scmp.ne.s32.totalorder %s69_s16, %s537_s17  ;;  %p543_p3 = scmp.lt.s32.totalorder %s537_s17, %s537_s17 }
  0x2a   :  { %p544_p4 = por %p543_p3, %p542_p2 }
  0x2c   :  { %p545_p5 = pnand %p544_p4, %p538_p1 }
  0x2e   :  { %548 = shalt.err (!%p545_p5)
}
  0x2f   :  { %74 = dma.hbm_to_vmem [thread:$0]  %s680_s7, 512, %s69_s16, [#allocation9], %s556_s22, %s556_s22, %s557_s23  }
  0x30   :  { %549 = dma.done.wait [#allocation4], 128  }
  0x31   :  { %550 = vsyncadd [#allocation4], 4294967168 }
  0x32   :  { %551 = dma.done.wait [#allocation6], 768  }
  0x33   :  { %552 = vsyncadd [#allocation6], 4294966528 }
  0x34   :  { %553 = dma.done.wait [#allocation9], 512  }
  0x35   :  { %554 = vsyncadd [#allocation9], 4294966784  ;;  %v561_v1 = vmov 0.0   ;;  %vm562_vm0 = vmmov 0   ;;  %v95_v2 = vld [vmem:[#allocation5 + $0x8] sm:$0xff]  ;;  %v94_v3 = vld [vmem:[#allocation5] sm:$0xff] }
  0x36   :  { %430 = vmatprep.subr.mxu0 %v561_v1  ;;  %434 = vmatprep.mubr.msk.f32.mxu0 %vm562_vm0, %v561_v1  ;;  %v93_v4 = vld [vmem:[#allocation3] sm:$0xff]  ;;  %vm103_vm1 = vcmask 130048   ;;  %v407_v5 = vld [vmem:[%s675_s2] ss:$0 sm:$0xff]  ;;  %vm177_vm2 = vcmask 261120   ;;  %v212_v15 = vld [vmem:[#allocation7 + $0x18] sm:$0xff] }
  0x37   :  { %437 = vmatprep.subr.mxu1 %v561_v1  ;;  %445 = vmatprep.mubr.msk.f32.mxu1 %vm562_vm0, %v561_v1  ;;  %v211_v16 = vld [vmem:[#allocation7 + $0x10] sm:$0xff]  ;;  %v210_v17 = vld [vmem:[#allocation7 + $0x8] sm:$0xff]  ;;  %v209_v18 = vld [vmem:[#allocation7] sm:$0xff]  ;;  %vm398_vm3 = vcmask 7168  }
  0x38   :  { %431 = vmatpush3.msra.mxu0 %v95_v2  ;;  %438 = vmatpush3.msra.mxu1 %v212_v15  ;;  %v297_v19 = vld [vmem:[#allocation8 + $0x18] sm:$0xff]  ;;  %v409_v24 = vld [vmem:[%s676_s3] ss:$0 sm:$0xff]  ;;  %v296_v30 = vld [vmem:[#allocation8 + $0x10] sm:$0xff] }
  0x39   :  { %432 = vmatprep.subr.mxu0 %v561_v1  ;;  %439 = vmatprep.subr.mxu1 %v561_v1  ;;  %v410_v26 = vld [vmem:[%s677_s4] ss:$0 sm:$0xff]  ;;  %v295_v31 = vld [vmem:[#allocation8 + $0x8] sm:$0xff] }
  0x3a   :  { %433 = vmatpush3.msra.mxu0 %v94_v3  ;;  %440 = vmatpush3.msra.mxu1 %v211_v16  ;;  %v294_v32 = vld [vmem:[#allocation8] sm:$0xff] }
  0x3b   :  { %435 = vmatmul.mubr.msk.f32.vlgmr.msra.gmra.mxu0 %vm103_vm1, %v93_v4  ;;  %448 = vmatprep.subr.mxu0 %v561_v1  ;;  %v411_v33 = vld [vmem:[%s679_s6] ss:$0 sm:$0xff] }
  0x3c   :  { %456 = vmatprep.mubr.msk.f32.mxu0 %vm562_vm0, %v561_v1  ;;  %441 = vmatprep.subr.mxu1 %v561_v1  ;;  %v413_v38 = vld [vmem:[%s681_s8] ss:$0 sm:$0xff] }
  0x3d   :  { %442 = vmatpush3.msra.mxu1 %v210_v17  ;;  %449 = vmatpush3.msra.mxu0 %v297_v19  ;;  %v415_v42 = vld [vmem:[%s682_s9] ss:$0 sm:$0xff] }
  0x3e   :  { %443 = vmatprep.subr.mxu1 %v561_v1  ;;  %450 = vmatprep.subr.mxu0 %v561_v1  ;;  %v416_v46 = vld [vmem:[#allocation2] ss:$0 sm:$0xff] }
  0x3f   :  { %444 = vmatpush3.msra.mxu1 %v209_v18  ;;  %451 = vmatpush3.msra.mxu0 %v296_v30 }
  0x40   :  { %452 = vmatprep.subr.mxu0 %v561_v1 }
  0x41   :  { %453 = vmatpush3.msra.mxu0 %v295_v31 }
  0x42   :  { %454 = vmatprep.subr.mxu0 %v561_v1 }
  0x43   :  { %455 = vmatpush3.msra.mxu0 %v294_v32 }
  0xfb   :  { %v173_v6 = vpop.f32.mrf.mxu0 }
  0xfc   :  { %v174_v7 = vadd.f32 %v407_v5, %v173_v6 }
  0xfd   :  { %v436_v8 = vpop.f32.mrf.mxu0 }
  0xfe   :  { %v178_v9 = vsel %vm177_vm2, %v174_v7, 0.0 }
  0xff   :  { %179 = vadd.xlane.f32.xlu0 %v178_v9 }
 0x188   :  { %v180_v10 = vpop.xlane.xlu0 %179 }
 0x189   :  { %v182_v11 = vmul.f32 0.03125, %v180_v10 }
 0x18b   :  { %v183_v12 = vsub.f32 %v174_v7, %v182_v11 }
 0x18d   :  { %v184_v13 = vmul.f32 %v183_v12, %v183_v12 }
 0x18f   :  { %v185_v14 = vsel %vm177_vm2, %v184_v13, 0.0 }
 0x190   :  { %186 = vadd.xlane.f32.xlu0 %v185_v14 }
 0x219   :  { %v187_v20 = vpop.xlane.xlu0 %186 }
 0x21a   :  { %v188_v21 = vmul.f32 0.03125, %v187_v20 }
 0x21c   :  { %v189_v22 = vadd.f32 1e-05, %v188_v21 }
 0x21e   :  { %467 = vrsqrt.f32 %v189_v22 }
 0x22b   :  { %v468_v23 = vpop.eup %467 }
 0x22c   :  { %v191_v25 = vmul.f32 %v468_v23, %v183_v12 }
 0x22e   :  { %v199_v27 = vmul.f32 %v409_v24, %v191_v25 }
 0x230   :  { %v207_v28 = vadd.f32 %v410_v26, %v199_v27 }
 0x232   :  { %v208_v29 = vmax.f32 %v207_v28, 0.0 }
 0x234   :  { %446 = vmatmul.mubr.msk.f32.vlgmr.msra.gmra.mxu1 %vm177_vm2, %v208_v29 }
 0x2f4   :  { %v289_v34 = vpop.f32.mrf.mxu1 }
 0x2f5   :  { %v290_v35 = vadd.f32 %v411_v33, %v289_v34 }
 0x2f6   :  { %v447_v36 = vpop.f32.mrf.mxu1 }
 0x2f7   :  { %v293_v37 = vmax.f32 %v290_v35, 0.0 }
 0x2f9   :  { %457 = vmatmul.mubr.msk.f32.vlgmr.msra.gmra.mxu0 %vm177_vm2, %v293_v37 }
 0x3b9   :  { %v374_v39 = vpop.f32.mrf.mxu0 }
 0x3ba   :  { %v375_v40 = vadd.f32 %v413_v38, %v374_v39 }
 0x3bb   :  { %v458_v41 = vpop.f32.mrf.mxu0 }
 0x3bc   :  { %v378_v43 = vmax.f32 %v375_v40, 0.0 }
 0x3be   :  { %v386_v44 = vmul.f32 %v415_v42, %v378_v43 }
 0x3c0   :  { %v387_v45 = vsel %vm177_vm2, %v386_v44, 0.0 }
 0x3c1   :  { %388 = vadd.xlane.f32.xlu1 %v387_v45 }
 0x44a   :  { %v389_v47 = vpop.xlane.xlu1 %388 }
 0x44b   :  { %v397_v48 = vadd.f32 %v416_v46, %v389_v47 }
 0x44d   :  { %399 = vst.msk [vmem:[%s684_s11] sm:$0xff] %vm398_vm3, %v397_v48 }
 0x44e   :  { %404 = vsyncpa [#allocation4], 1 }
 0x44f   :  { %405 = vsyncpa [#allocation6], 1 }
 0x450   :  { %406 = vsyncpa [#allocation9], 1 }

</bundles_post_ra>
